<compile_context>
chip_gen: v5e
topology: v5e:2x2
jax: 0.10.0
libtpu: 0.0.40
codegen_flags: <defaults>
</compile_context>

<pallas_src>
import functools

import jax
import jax.numpy as jnp
from jax.experimental import pallas as pl
from jax.experimental.pallas import tpu as pltpu


def _rnn_seq_kernel(x_ref, h0_ref, wx_ref, wh_ref, b_ref, out_ref, h_scratch):
    """One grid step == one RNN timestep.

    x_ref    : (1, B, I)  VMEM   current timestep's input
    h0_ref   : (B, H)     VMEM   initial hidden state (resident, read at t==0)
    wx_ref   : (I, H)     VMEM   resident across all t
    wh_ref   : (H, H)     VMEM   resident across all t
    b_ref    : (1, H)     VMEM   resident across all t
    out_ref  : (1, B, H)  VMEM   this timestep's output hidden state
    h_scratch: (B, H) f32 VMEM   recurrent carry, persists across grid steps
    """
    t = pl.program_id(0)

    @pl.when(t == 0)
    def _():
        h_scratch[...] = h0_ref[...].astype(jnp.float32)

    # tanh(cat(x, h) @ W.T + b) == tanh(x @ Wx + h @ Wh + b)
    acc = jnp.dot(x_ref[0], wx_ref[...], preferred_element_type=jnp.float32)
    acc = acc + jnp.dot(h_scratch[...], wh_ref[...],
                        preferred_element_type=jnp.float32)
    acc = acc + b_ref[...]
    next_h = jnp.tanh(acc)

    h_scratch[...] = next_h
    out_ref[0] = next_h.astype(out_ref.dtype)


def prepare_rnn_params(w_i2h, b_i2h, input_size):
    """Split / transpose the i2h weight ONCE, outside the hot path.

    w_i2h : (hidden, input+hidden)  PyTorch nn.Linear layout
    b_i2h : (hidden,)
    Returns (wx, wh, b2d) with wx:(input,hidden), wh:(hidden,hidden), b2d:(1,hidden).
    """
    hidden_size = w_i2h.shape[0]
    wx = jnp.asarray(w_i2h[:, :input_size].T)   # (I, H)
    wh = jnp.asarray(w_i2h[:, input_size:].T)   # (H, H)
    b2d = jnp.asarray(b_i2h).reshape(1, hidden_size)
    return wx, wh, b2d


@functools.partial(jax.jit, static_argnames=())
def rnn_forward_sequence(x_seq, h0, wx, wh, b2d):
    """Run T RNN steps inside a single Pallas kernel.

    x_seq : (T, B, input_size)   time-major inputs
    h0    : (B, hidden_size)     initial hidden state
    wx    : (input_size, hidden) pre-transposed (from prepare_rnn_params)
    wh    : (hidden, hidden)     pre-transposed
    b2d   : (1, hidden)
    Returns (T, B, hidden) — hidden state after each step (last slice == final h).
    """
    T, B, input_size = x_seq.shape
    hidden_size = h0.shape[1]

    # Pad batch to a sublane multiple so the (B, *) blocks are layout friendly.
    pad_b = (-B) % 8
    if pad_b:
        x_seq = jnp.pad(x_seq, ((0, 0), (0, pad_b), (0, 0)))
        h0 = jnp.pad(h0, ((0, pad_b), (0, 0)))
    Bp = B + pad_b

    out = pl.pallas_call(
        _rnn_seq_kernel,
        out_shape=jax.ShapeDtypeStruct((T, Bp, hidden_size), x_seq.dtype),
        grid_spec=pltpu.PrefetchScalarGridSpec(
            num_scalar_prefetch=0,
            grid=(T,),
            in_specs=[
                # x_t: new block each step
                pl.BlockSpec((1, Bp, input_size), lambda t: (t, 0, 0)),
                # h0, weights, bias: same block every step -> resident in VMEM
                pl.BlockSpec((Bp, hidden_size), lambda t: (0, 0)),
                pl.BlockSpec((input_size, hidden_size), lambda t: (0, 0)),
                pl.BlockSpec((hidden_size, hidden_size), lambda t: (0, 0)),
                pl.BlockSpec((1, hidden_size), lambda t: (0, 0)),
            ],
            out_specs=pl.BlockSpec((1, Bp, hidden_size), lambda t: (t, 0, 0)),
            scratch_shapes=[pltpu.VMEM((Bp, hidden_size), jnp.float32)],
        ),
        compiler_params=pltpu.CompilerParams(
            # Time axis carries the recurrence -> must be "arbitrary".
            dimension_semantics=("arbitrary",)),
    )(x_seq, h0, wx, wh, b2d)

    return out[:, :B, :]


def rnn_forward(x, h, wx, wh, b2d):
    """Single-step forward, identical semantics to the PyTorch RNN.forward."""
    return rnn_forward_sequence(x[None], h, wx, wh, b2d)[0]


def init_rnn_params(key, input_size, hidden_size):
    """Deterministic nn.Linear-style init for i2h (uniform +/- 1/sqrt(fan_in))."""
    fan_in = input_size + hidden_size
    bound = 1.0 / jnp.sqrt(jnp.float32(fan_in))
    kw, kb = jax.random.split(key)
    w = jax.random.uniform(kw, (hidden_size, fan_in), jnp.float32,
                           minval=-bound, maxval=bound)
    b = jax.random.uniform(kb, (hidden_size,), jnp.float32,
                           minval=-bound, maxval=bound)
    return w, b


if __name__ == "__main__":
    # Small shapes consistent with the module (hidden_size=128 in the script).
    batch = 8
    input_size = 64
    hidden_size = 128
    seq_len = 16

    key = jax.random.PRNGKey(0)
    k_x, k_p = jax.random.split(key)

    x_seq = jax.random.normal(k_x, (seq_len, batch, input_size), jnp.float32)
    h0 = jnp.zeros((batch, hidden_size), jnp.float32)  # init_hidden(batch)

    w_i2h, b_i2h = init_rnn_params(k_p, input_size, hidden_size)

    # Weight split/transpose done once, outside the hot loop.
    wx, wh, b2d = prepare_rnn_params(w_i2h, b_i2h, input_size)

    # Whole sequence in one kernel launch (weights resident, h carried in VMEM).
    h_all = rnn_forward_sequence(x_seq, h0, wx, wh, b2d)
    h_all = jax.block_until_ready(h_all)

    # Reference: step the plain-JAX equivalent of the PyTorch forward T times.
    h_ref = h0
    refs = []
    for t in range(seq_len):
        combined = jnp.concatenate([x_seq[t], h_ref], axis=1)
        h_ref = jnp.tanh(combined @ w_i2h.T + b_i2h)
        refs.append(h_ref)
    ref_all = jnp.stack(refs)

    assert h_all.shape == ref_all.shape
    assert jnp.allclose(h_all, ref_all, atol=1e-5, rtol=1e-5), \
        "sequence mismatch vs reference"

    # Single-step path (exact PyTorch forward signature) also checked.
    one = rnn_forward(x_seq[0], h0, wx, wh, b2d)
    one = jax.block_until_ready(one)
    one_ref = jnp.tanh(jnp.concatenate([x_seq[0], h0], axis=1) @ w_i2h.T + b_i2h)
    assert jnp.allclose(one, one_ref, atol=1e-5, rtol=1e-5), \
        "single-step mismatch vs reference"

    print("KERNEL_OK")
</pallas_src>

<mosaic_0001>
module attributes {stable_mosaic.version = 11 : i64} {
  func.func @_rnn_seq_kernel(%arg0: i32, %arg1: memref<1x8x64xf32, #tpu.memory_space<vmem>>, %arg2: memref<8x128xf32, #tpu.memory_space<vmem>>, %arg3: memref<64x128xf32, #tpu.memory_space<vmem>>, %arg4: memref<128x128xf32, #tpu.memory_space<vmem>>, %arg5: memref<1x128xf32, #tpu.memory_space<vmem>>, %arg6: memref<1x8x128xf32, #tpu.memory_space<vmem>>, %arg7: memref<8x128xf32, #tpu.memory_space<vmem>>) attributes {dimension_semantics = [#tpu.dimension_semantics<arbitrary>], iteration_bounds = array<i64: 16>, scalar_prefetch = 0 : i64, scratch_operands = 1 : i64, tpu.core_type = #tpu.core_type<tc>, window_params = [{transform_indices = @transform_0, window_bounds = array<i64: 1, 8, 64>}, {pipeline_mode = #tpu.pipeline_mode<synchronous>, transform_indices = @transform_1, window_bounds = array<i64: 8, 128>}, {pipeline_mode = #tpu.pipeline_mode<synchronous>, transform_indices = @transform_2, window_bounds = array<i64: 64, 128>}, {pipeline_mode = #tpu.pipeline_mode<synchronous>, transform_indices = @transform_3, window_bounds = array<i64: 128, 128>}, {pipeline_mode = #tpu.pipeline_mode<synchronous>, transform_indices = @transform_4, window_bounds = array<i64: 1, 128>}, {transform_indices = @transform_5, window_bounds = array<i64: 1, 8, 128>}]} {
    %c0_i32 = arith.constant 0 : i32
    %0 = arith.cmpi eq, %arg0, %c0_i32 : i32
    %1 = arith.extui %0 : i1 to i32
    %c0_i32_0 = arith.constant 0 : i32
    %2 = arith.cmpi ne, %1, %c0_i32_0 : i32
    scf.if %2 {
      %c0_17 = arith.constant 0 : index
      %c0_18 = arith.constant 0 : index
      %19 = vector.load %arg2[%c0_17, %c0_18] : memref<8x128xf32, #tpu.memory_space<vmem>>, vector<8x128xf32>
      %c0_19 = arith.constant 0 : index
      %c0_20 = arith.constant 0 : index
      %20 = vector.load %arg7[%c0_19, %c0_20] : memref<8x128xf32, #tpu.memory_space<vmem>>, vector<8x128xf32>
      tpu.vector_store %arg7[%c0_19, %c0_20], %19 {strides = array<i32>} : memref<8x128xf32, #tpu.memory_space<vmem>>, vector<8x128xf32>,
    } else {
    }
    %c0 = arith.constant 0 : index
    %c0_1 = arith.constant 0 : index
    %c0_2 = arith.constant 0 : index
    %3 = vector.load %arg1[%c0, %c0_1, %c0_2] : memref<1x8x64xf32, #tpu.memory_space<vmem>>, vector<1x8x64xf32>
    %4 = vector.shape_cast %3 : vector<1x8x64xf32> to vector<8x64xf32>
    %c0_3 = arith.constant 0 : index
    %c0_4 = arith.constant 0 : index
    %5 = vector.load %arg3[%c0_3, %c0_4] : memref<64x128xf32, #tpu.memory_space<vmem>>, vector<64x128xf32>
    %cst = arith.constant dense<0.000000e+00> : vector<8x128xf32>
    %6 = tpu.matmul %4, %5, %cst {dimension_numbers = #tpu.dot_dimension_numbers<[1], [0], [0], [1], [0, 0, 1, 1], [], []>} : vector<8x64xf32>, vector<64x128xf32>, vector<8x128xf32> -> vector<8x128xf32>
    %c0_5 = arith.constant 0 : index
    %c0_6 = arith.constant 0 : index
    %7 = vector.load %arg7[%c0_5, %c0_6] : memref<8x128xf32, #tpu.memory_space<vmem>>, vector<8x128xf32>
    %c0_7 = arith.constant 0 : index
    %c0_8 = arith.constant 0 : index
    %8 = vector.load %arg4[%c0_7, %c0_8] : memref<128x128xf32, #tpu.memory_space<vmem>>, vector<128x128xf32>
    %cst_9 = arith.constant dense<0.000000e+00> : vector<8x128xf32>
    %9 = tpu.matmul %7, %8, %cst_9 {dimension_numbers = #tpu.dot_dimension_numbers<[1], [0], [0], [1], [0, 0, 1, 1], [], []>} : vector<8x128xf32>, vector<128x128xf32>, vector<8x128xf32> -> vector<8x128xf32>
    %10 = arith.addf %6, %9 : vector<8x128xf32>
    %c0_10 = arith.constant 0 : index
    %c0_11 = arith.constant 0 : index
    %11 = vector.load %arg5[%c0_10, %c0_11] : memref<1x128xf32, #tpu.memory_space<vmem>>, vector<1x128xf32>
    %12 = vector.broadcast %11 : vector<1x128xf32> to vector<8x128xf32>
    %13 = arith.addf %10, %12 : vector<8x128xf32>
    %14 = math.tanh %13 : vector<8x128xf32>
    %c0_12 = arith.constant 0 : index
    %c0_13 = arith.constant 0 : index
    %15 = vector.load %arg7[%c0_12, %c0_13] : memref<8x128xf32, #tpu.memory_space<vmem>>, vector<8x128xf32>
    tpu.vector_store %arg7[%c0_12, %c0_13], %14 {strides = array<i32>} : memref<8x128xf32, #tpu.memory_space<vmem>>, vector<8x128xf32>,
    %c0_14 = arith.constant 0 : index
    %c0_15 = arith.constant 0 : index
    %c0_16 = arith.constant 0 : index
    %16 = vector.load %arg6[%c0_14, %c0_15, %c0_16] : memref<1x8x128xf32, #tpu.memory_space<vmem>>, vector<1x8x128xf32>
    %17 = vector.shape_cast %16 : vector<1x8x128xf32> to vector<8x128xf32>
    %18 = vector.shape_cast %14 : vector<8x128xf32> to vector<1x8x128xf32>
    tpu.vector_store %arg6[%c0_14, %c0_15, %c0_16], %18 {strides = array<i32>} : memref<1x8x128xf32, #tpu.memory_space<vmem>>, vector<1x8x128xf32>,
    return
  }
  func.func @transform_0(%arg0: i32) -> (i32, i32, i32) {
    %c0_i32 = arith.constant 0 : i32
    %c0_i32_0 = arith.constant 0 : i32
    %c0_i32_1 = arith.constant 0 : i32
    return %arg0, %c0_i32, %c0_i32_0 : i32, i32, i32
  }
  func.func @transform_1(%arg0: i32) -> (i32, i32) {
    %c0_i32 = arith.constant 0 : i32
    %c0_i32_0 = arith.constant 0 : i32
    %c0_i32_1 = arith.constant 0 : i32
    return %c0_i32, %c0_i32_0 : i32, i32
  }
  func.func @transform_2(%arg0: i32) -> (i32, i32) {
    %c0_i32 = arith.constant 0 : i32
    %c0_i32_0 = arith.constant 0 : i32
    %c0_i32_1 = arith.constant 0 : i32
    return %c0_i32, %c0_i32_0 : i32, i32
  }
  func.func @transform_3(%arg0: i32) -> (i32, i32) {
    %c0_i32 = arith.constant 0 : i32
    %c0_i32_0 = arith.constant 0 : i32
    %c0_i32_1 = arith.constant 0 : i32
    return %c0_i32, %c0_i32_0 : i32, i32
  }
  func.func @transform_4(%arg0: i32) -> (i32, i32) {
    %c0_i32 = arith.constant 0 : i32
    %c0_i32_0 = arith.constant 0 : i32
    %c0_i32_1 = arith.constant 0 : i32
    return %c0_i32, %c0_i32_0 : i32, i32
  }
  func.func @transform_5(%arg0: i32) -> (i32, i32, i32) {
    %c0_i32 = arith.constant 0 : i32
    %c0_i32_0 = arith.constant 0 : i32
    %c0_i32_1 = arith.constant 0 : i32
    return %arg0, %c0_i32, %c0_i32_0 : i32, i32, i32
  }
}

</mosaic_0001>

<bundles_post_ra>
// kernel: rnn_forward_sequence.1
= control target key start
LH: loop header
LB: loop body
LE: loop exit
PB: predicated region body
PF: predicated region fallthrough
CT: control target
= control target key end

     0   :  { %10 = vsyncpa [#allocation4], 0  ;;  %s991_s0 = inlined_call_operand.hbm [shape: f32[16,8,64], index: 0, kind: input, shape index: {}]   ;;  %s992_s1 = inlined_call_operand.hbm [shape: f32[8,128], index: 1, kind: input, shape index: {}]   ;;  %s993_s2 = inlined_call_operand.hbm [shape: f32[64,128], index: 2, kind: input, shape index: {}]   ;;  %s994_s3 = inlined_call_operand.hbm [shape: f32[128,128], index: 3, kind: input, shape index: {}]   ;;  %s995_s4 = inlined_call_operand.vmem [shape: f32[1,128], index: 4, kind: input, shape index: {}]   ;;  %s996_s5 = inlined_call_operand.hbm [shape: f32[16,8,128], index: 5, kind: output, shape index: {}]  }
   0x1   :  { %12 = vsyncpa [#allocation4 + $0x1], 0 }
   0x2   :  { %13 = vsyncpa [#allocation7], 0 }
   0x3   :  { %14 = vsyncpa [#allocation10], 0 }
   0x4   :  { %15 = vsyncpa [#allocation5], 0 }
   0x5   :  { %17 = vsyncpa [#allocation5 + $0x1], 0  ;;  %s822_s18 = smov 0   ;;  %s824_s19 = smov 0  }
   0x6   :  { %s826_s20 = smov 0   ;;  %s828_s21 = smov 0  }
   0x7 LB: > { %s843_s22 = sadd.s32 4294967295, %s785_s21   ;;  %s489_s23 = sadd.s32 4294967294, %s785_s21   ;;  %s785_s21 = sphi %s828_s21, %s1007_s21   ;;  %s781_s20 = sphi %s826_s20, %s1006_s20   ;;  %s777_s19 = sphi %s824_s19, %s1005_s19   ;;  %s773_s18 = sphi %s822_s18, %s1004_s18  }
   0x8   : > { %p43_p0 = scmp.ne.s32.totalorder %s777_s19, %s773_s18  ;;  %p44_p1 = scmp.eq.s32.totalorder %s843_s22, 0 }
   0x9   : > { %p151_p2 = scmp.eq.s32.totalorder %s843_s22, 15  ;;  %p157_p3 = scmp.eq.s32.totalorder %s489_s23, 15 }
   0xa   : > { %p852_p4 = por %p44_p1, %p43_p0  ;;  %p490_p5 = scmp.ge.s32.totalorder %s785_s21, 1 }
   0xb   : > { %p857_p6 = por %p157_p3, %p43_p0  ;;  %p164_p7 = scmp.lt.s32.totalorder %s785_s21, 17 }
   0xc   : > { %s176_s28 = sshll.u32 %s992_s1, 4  ;;  %s787_s30 = smov [#allocation6]   ;;  %s177_s28 = int_to_ptr.hbm [resolvable:$true] %s176_s28 }
   0xd   : > { %p866_p9 = pnand %p490_p5, %p164_p7  ;;  %s178_s6 = sshll.u32 %s787_s30, 4  ;;  %s179_s6 = int_to_ptr.vmem [resolvable:$true] %s178_s6 }
   0xe   : > { %s187_s9 = sshll.u32 %s993_s2, 4  ;;  %s788_s11 = smov [#allocation8]   ;;  %s188_s9 = int_to_ptr.hbm [resolvable:$true] %s187_s9 }
   0xf   : > { %p525_p10 = pneg %p866_p9  ;;  %s189_s12 = sshll.u32 %s788_s11, 4  ;;  %s190_s12 = int_to_ptr.vmem [resolvable:$true] %s189_s12 }
  0x10   : > { %s789_s13 = smov 128   ;;  %s790_s14 = smov 8  }
  0x11   : > { %p877_p11 = pnand %p525_p10, %p44_p1  ;;  %s201_s17 = sshll.u32 %s994_s3, 4  ;;  %s202_s17 = int_to_ptr.hbm [resolvable:$true] %s201_s17 }
  0x12   : > { %s791_s23 = smov [#allocation9]   ;;  %s891_s27 = sadd.s32 1, %s785_s21  }
  0x13   : > { %528 = dma.hbm_to_vmem [thread:$0]  (!%p877_p11), %s177_s28, 128, %s179_s6, [#allocation7]  }
  0x14   : > { %531 = dma.hbm_to_vmem [thread:$0]  (!%p877_p11), %s188_s9, 1024, %s190_s12, [#allocation7], %s789_s13, %s789_s13, %s790_s14  }
  0x15   : > { %s203_s26 = sshll.u32 %s791_s23, 4  ;;  %s27_s28 = ssub.s32 %s785_s21, %s891_s27  ;;  %s204_s26 = int_to_ptr.vmem [resolvable:$true] %s203_s26 }
  0x16   : > { %534 = dma.hbm_to_vmem [thread:$0]  (!%p877_p11), %s202_s17, 2048, %s204_s26, [#allocation10], %s789_s13, %s789_s13, %s790_s14  }
  0x17   : > { %s30_s30 = sadd.s32 1, %s781_s20  ;;  %p28_p12 = scmp.eq.s32.totalorder %s27_s28, 0 }
  0x18   : > { %p37_p13 = scmp.ne.s32.totalorder %s781_s20, %s777_s19  ;;  %p38_p0 = scmp.eq.s32.totalorder %s785_s21, 0 }
  0x19   : > { %s900_s6 = scalar_select %p28_p12, %s781_s20, %s30_s30  }
  0x1a   : > { %p904_p3 = por %p151_p2, %p37_p13  ;;  %p546_p5 = scmp.lt.s32.totalorder %s785_s21, 16 }
  0x1b   : > { %s220_s8 = sand.u32 1, %s781_s20   ;;  %s496_s9 = sshll.u32 %s785_s21, 3 }
  0x1c   : > { %p39_p7 = por %p38_p0, %p37_p13  ;;  %s495_s10 = sshll.u32 %s220_s8, 3 }
  0x1d   : > { %s228_s13 = scalar_lea.hbm %s991_s0, %s496_s9  ;;  %s224_s15 = scalar_lea.vmem [#allocation3], %s495_s10 }
  0x1e   : > { %s230_s14 = sshll.u32 %s228_s13, 4  ;;  %s232_s16 = sshll.u32 %s224_s15, 4  ;;  %s231_s14 = int_to_ptr.hbm [resolvable:$true] %s230_s14  ;;  %s233_s16 = int_to_ptr.vmem [resolvable:$true] %s232_s16 }
  0x1f   : > { %p914_p10 = pnand %p546_p5, %p39_p7  ;;  %s221_s23 = scalar_lea.sflag [#allocation4], %s220_s8 }
  0x20   : > { %s681_s26 = sshra.s32 %s231_s14, 4  ;;  %s688_s10 = scalar_lea.hbm %s991_s0, 128  ;;  %s682_s26 = int_to_ptr.hbm [resolvable:$true] %s681_s26 }
  0x21   : > { %s683_s28 = scalar_lea.hbm %s682_s26, 8  ;;  %p685_p11 = pneg %p914_p10 }
  0x22   : > { %p684_p2 = scmp.ne.s32.totalorder %s682_s26, %s683_s28  ;;  %p689_p0 = scmp.lt.s32.totalorder %s682_s26, %s991_s0 }
  0x23   : > { %p690_p5 = scmp.lt.s32.totalorder %s688_s10, %s683_s28 }
  0x24   : > { %p686_p12 = pnand %p685_p11, %p684_p2 }
  0x25   : > { %p691_p7 = por %p690_p5, %p689_p0 }
  0x26   : > { %p687_p13 = pneg %p686_p12 }
  0x28   : > { %p692_p8 = pnand %p691_p7, %p687_p13 }
  0x2a   : > { %695 = shalt.err (!%p692_p8)
}
  0x2b   : > { %538 = dma.hbm_to_vmem [thread:$0]  (!%p914_p10), %s231_s14, 128, %s233_s16, %s221_s23  }
  0x2c   : > { %241 = sbr.rel (%p866_p9) target bundleno = 236 (0xec), region = 40  ;;  %s931_s8 = sand.u32 (!%p866_p9), 1, %s777_s19  }
  0x2d   : > { %s498_s13 = sshll.u32 (!%p866_p9), %s931_s8, 3  ;;  %s244_s15 = scalar_lea.sflag (!%p866_p9), [#allocation4], %s931_s8 }
  0x2e   : > { %s935_s30 = scalar_lea.vmem (!%p866_p9), [#allocation3], %s498_s13 }
  0x31   : > { %756 = dma.done.wait (%p852_p4), %s244_s15, 128  }
  0x32   : > { %758 = vsyncadd (%p852_p4), %s244_s15, 4294967168 }
  0x33   : > { %760 = dma.done.wait (%p44_p1), [#allocation7], 1152  }
  0x34   : > { %762 = vsyncadd (%p44_p1), [#allocation7], 4294966144 }
  0x35   : > { %764 = dma.done.wait (%p44_p1), [#allocation10], 2048  }
  0x36   : > { %766 = vsyncadd (%p44_p1), [#allocation10], 4294965248  ;;  %s949_s29 = scalar_lea.vmem [#allocation11], %s498_s13  ;;  %p1003_p8 = scmp.ne.s32.totalorder %s843_s22, 0 }
  0x38   : > { %293 = sbr.rel (%p1003_p8) target bundleno = 63 (0x3f), region = 60 }
  0x3d   : > { %v294_v0 = vld [vmem:[#allocation6] sm:$0xff] }
  0x3e   : > { %295 = vst [vmem:[#allocation2] sm:$0xff] %v294_v0 }
  0x3f PF: > { %v321_v1 = vld [vmem:[#allocation9 + $0x78] sm:$0xff]  ;;  %v320_v2 = vld [vmem:[#allocation9 + $0x70] sm:$0xff]  ;;  %v319_v3 = vld [vmem:[#allocation9 + $0x68] sm:$0xff]  ;;  %vm342_vm0 = vcmask 523264   ;;  %s506_s16 = sshll.u32 %s843_s22, 3  ;;  %s387_s28 = sshll.u32 %s949_s29, 4  ;;  %s388_s28 = int_to_ptr.vmem [resolvable:$true] %s387_s28 }
  0x40   : > { %322 = vmatpush.msra.mxu0 %v321_v1  ;;  %v304_v4 = vld [vmem:[#allocation8 + $0x38] sm:$0xff]  ;;  %v303_v5 = vld [vmem:[#allocation8 + $0x30] sm:$0xff]  ;;  %v318_v6 = vld [vmem:[#allocation9 + $0x60] sm:$0xff]  ;;  %s385_s26 = scalar_lea.hbm %s996_s5, %s506_s16  ;;  %s375_s10 = scalar_lea.sflag [#allocation5], %s931_s8 }
  0x41   : > { %354 = vmatpush.msra.mxu1 %v304_v4  ;;  %v302_v7 = vld [vmem:[#allocation8 + $0x28] sm:$0xff]  ;;  %v317_v8 = vld [vmem:[#allocation9 + $0x58] sm:$0xff]  ;;  %v301_v9 = vld [vmem:[#allocation8 + $0x20] sm:$0xff]  ;;  %s389_s9 = sshll.u32 %s385_s26, 4  ;;  %s731_s15 = scalar_lea.hbm %s996_s5, 128  ;;  %s390_s9 = int_to_ptr.hbm [resolvable:$true] %s389_s9 }
  0x42   : > { %323 = vmatpush.msra.mxu0 %v320_v2  ;;  %v316_v10 = vld [vmem:[#allocation9 + $0x50] sm:$0xff]  ;;  %v300_v11 = vld [vmem:[#allocation8 + $0x18] sm:$0xff]  ;;  %v315_v12 = vld [vmem:[#allocation9 + $0x48] sm:$0xff]  ;;  %s725_s11 = sshra.s32 %s390_s9, 4  ;;  %s726_s11 = int_to_ptr.hbm [resolvable:$true] %s725_s11 }
  0x43   : > { %355 = vmatpush.msra.mxu1 %v303_v5  ;;  %v299_v13 = vld [vmem:[#allocation8 + $0x10] sm:$0xff]  ;;  %v314_v14 = vld [vmem:[#allocation9 + $0x40] sm:$0xff]  ;;  %v298_v15 = vld [vmem:[#allocation8 + $0x8] sm:$0xff]  ;;  %s727_s12 = scalar_lea.hbm %s726_s11, 8  ;;  %p732_p10 = scmp.lt.s32.totalorder %s726_s11, %s996_s5 }
  0x44   : > { %324 = vmatpush.msra.mxu0 %v319_v3  ;;  %v313_v16 = vld [vmem:[#allocation9 + $0x38] sm:$0xff]  ;;  %v297_v17 = vld [vmem:[#allocation8] sm:$0xff]  ;;  %v312_v18 = vld [vmem:[#allocation9 + $0x30] sm:$0xff]  ;;  %p728_p1 = scmp.ne.s32.totalorder %s726_s11, %s727_s12  ;;  %p733_p2 = scmp.lt.s32.totalorder %s731_s15, %s727_s12 }
  0x45   : > { %356 = vmatpush.msra.mxu1 %v302_v7  ;;  %v296_v19 = vld [vmem:[%s935_s30] sm:$0xff]  ;;  %v310_v21 = vld [vmem:[#allocation9 + $0x20] sm:$0xff]  ;;  %v309_v22 = vld [vmem:[#allocation9 + $0x18] sm:$0xff] }
  0x46   : > { %325 = vmatpush.msra.mxu0 %v318_v6  ;;  %v311_v20 = vld [vmem:[#allocation9 + $0x28] sm:$0xff]  ;;  %v308_v23 = vld [vmem:[#allocation9 + $0x10] sm:$0xff]  ;;  %v306_v25 = vld [vmem:[#allocation9] sm:$0xff]  ;;  %p729_p4 = pnand %p728_p1, %p904_p3  ;;  %p734_p11 = por %p733_p2, %p732_p10 }
  0x47   : > { %357 = vmatpush.msra.mxu1 %v301_v9  ;;  %v307_v24 = vld [vmem:[#allocation9 + $0x8] sm:$0xff]  ;;  %v305_v26 = vld [vmem:[#allocation2] sm:$0xff] }
  0x48   : > { %326 = vmatpush.msra.mxu0 %v317_v8  ;;  %v588_v28 = vld [vmem:[%s995_s4] ss:$0 sm:$0xff]  ;;  %p730_p9 = pneg %p729_p4 }
  0x49   : > { %358 = vmatpush.msra.mxu1 %v300_v11 }
  0x4a   : > { %327 = vmatpush.msra.mxu0 %v316_v10  ;;  %p735_p12 = pnand %p734_p11, %p730_p9 }
  0x4b   : > { %359 = vmatpush.msra.mxu1 %v299_v13 }
  0x4c   : > { %328 = vmatpush.msra.mxu0 %v315_v12 }
  0x4d   : > { %360 = vmatpush.msra.mxu1 %v298_v15 }
  0x4e   : > { %329 = vmatpush.msra.mxu0 %v314_v14 }
  0x4f   : > { %361 = vmatpush.msra.mxu1 %v297_v17 }
  0x50   : > { %330 = vmatpush.msra.mxu0 %v313_v16  ;;  %504 = vmatmul.msk.f32.vlgmr.msra.gmra.mxu1 %vm342_vm0, %v296_v19 }
  0x52   : > { %331 = vmatpush.msra.mxu0 %v312_v18 }
  0x54   : > { %332 = vmatpush.msra.mxu0 %v311_v20 }
  0x56   : > { %333 = vmatpush.msra.mxu0 %v310_v21 }
  0x58   : > { %334 = vmatpush.msra.mxu0 %v309_v22 }
  0x5a   : > { %335 = vmatpush.msra.mxu0 %v308_v23 }
  0x5c   : > { %336 = vmatpush.msra.mxu0 %v307_v24 }
  0x5e   : > { %337 = vmatpush.msra.mxu0 %v306_v25 }
  0x5f   : > { %338 = vmatmul.f32.vlgmr.msra.gmra.mxu0 %v305_v26 }
  0xcd   : > { %v363_v27 = vpop.f32.mrf.mxu1 }
  0xdc   : > { %v339_v29 = vpop.f32.mrf.mxu0 }
  0xdd   : > { %v364_v30 = vadd.f32 %v363_v27, %v339_v29 }
  0xdf   : > { %v370_v31 = vadd.f32 %v588_v28, %v364_v30 }
  0xe1   : > { %589 = vtanh.f32 %v370_v31 }
  0xe7   : > { %v590_v32 = vpop.eup %589 }
  0xe8   : > { %372 = vst [vmem:[#allocation2] sm:$0xff] %v590_v32 }
  0xe9   : > { %373 = vst [vmem:[%s949_s29] sm:$0xff] %v590_v32 }
  0xea   : > { %738 = shalt.err (!%p735_p12)
}
  0xeb   : > { %523 = dma.vmem_to_hbm [thread:$0]  (%p904_p3), %s388_s28, 128, %s390_s9, %s375_s10  }
  0xec PF: > { %p550_p13 = scmp.ge.s32.totalorder %s785_s21, 2  ;;  %s401_s8 = sand.u32 1, %s773_s18  }
  0xed   : > { %s402_s29 = scalar_lea.sflag [#allocation5], %s401_s8 }
  0xee   : > { %p540_p0 = pnand %p550_p13, %p857_p6 }
  0xf0   : > { %p541_p5 = pneg %p540_p0 }
  0xf2   : > { %768 = dma.done.wait (%p541_p5), %s402_s29, 128  }
  0xf3   : > { %770 = vsyncadd (%p541_p5), %s402_s29, 4294967168  ;;  %p20_p7 = scmp.ge.s32.totalorder %s891_s27, 18   ;;  %s1004_s18 = smov %s777_s19 }
  0xf4   : > { %s1005_s19 = smov %s781_s20  ;;  %s1006_s20 = smov %s900_s6 }
  0xf5   : > { %s1007_s21 = smov %s891_s27  ;;  %22 = sbr.rel (!%p20_p7) target bundleno = 7 (0x7), region = 101 }
  0xfa   :  { %408 = vsyncpa [#allocation4], 1 }
  0xfb   :  { %410 = vsyncpa [#allocation4 + $0x1], 1 }
  0xfc   :  { %411 = vsyncpa [#allocation7], 1 }
  0xfd   :  { %412 = vsyncpa [#allocation10], 1 }
  0xfe   :  { %413 = vsyncpa [#allocation5], 1 }
  0xff   :  { %415 = vsyncpa [#allocation5 + $0x1], 1 }

</bundles_post_ra>
